<compile_context>
chip_gen: v5e
topology: v5e:2x2
jax: 0.10.0
libtpu: 0.0.40
codegen_flags: <defaults>
</compile_context>

<pallas_src>
import jax
import jax.numpy as jnp
from jax import lax
from jax.experimental import pallas as pl
from jax.experimental.pallas import tpu as pltpu

# Large negative finite value masking padded classes: exp(-1e30 - m) underflows
# cleanly to exactly 0.0 (no inf/NaN arithmetic) as long as one real class exists.
_NEG_BIG = -1e30


def _round_up(n, m):
    return ((n + m - 1) // m) * m


# --------------------------------------------------------------------------
# Kernel
# --------------------------------------------------------------------------
def protonet_kernel(x_ref, w_ref, b_ref, o_ref):
    # Cast the x tile to the compute dtype (bf16 by default) so the MXU runs
    # at full rate; accumulation stays f32 via preferred_element_type.
    x = x_ref[...].astype(w_ref.dtype)
    # logits = x @ W^T + b: contract the feature axis of both operands so the
    # [C_pad, F_pad] weight is consumed in its PyTorch layout (NT matmul).
    logits = lax.dot_general(
        x, w_ref[...],
        dimension_numbers=(((1,), (1,)), ((), ())),
        preferred_element_type=jnp.float32,
    )                                       # [tm, C_pad] f32
    logits = logits + b_ref[...]            # (1, C_pad) broadcast; pads -> -1e30

    # Numerically stable softmax over the lane-dense (padded) class axis.
    m = jnp.max(logits, axis=1, keepdims=True)
    e = jnp.exp(logits - m)                 # padded classes -> exactly 0.0
    denom = jnp.sum(e, axis=1, keepdims=True)
    # EXACT reciprocal (approx=False): only a (tm, 1) column, nowhere near the
    # critical path, and it keeps row sums == 1 to f32 precision.
    o_ref[...] = (e * pl.reciprocal(denom, approx=False)).astype(o_ref.dtype)


# --------------------------------------------------------------------------
# Parameter preparation (hoisted out of the per-call path; do once at init)
# --------------------------------------------------------------------------
def prepare_protonet_params(weight, bias, *, compute_dtype=jnp.bfloat16):
    """Pad & cast the Linear parameters once.

    weight: [C, F] (PyTorch Linear layout), bias: [C].
    Returns (weight_p [C_pad, F_pad] compute_dtype,
             bias_p   [1, C_pad] float32 (padded classes = -1e30),
             C, F).
    """
    C, F = weight.shape
    C_pad = _round_up(max(C, 128), 128)   # lane-dense logits / output stores
    F_pad = _round_up(max(F, 128), 128)   # full-width MXU contraction
    w_p = jnp.pad(weight.astype(jnp.float32),
                  ((0, C_pad - C), (0, F_pad - F))).astype(compute_dtype)
    b_p = jnp.pad(bias.astype(jnp.float32), (0, C_pad - C),
                  constant_values=_NEG_BIG).reshape(1, C_pad)
    return w_p, b_p, C, F


# --------------------------------------------------------------------------
# Per-generation defaults (128 MiB VMEM on v5e/v6e, 64 MiB on v7x)
# --------------------------------------------------------------------------
def _default_config():
    vmem_cap = None
    try:
        vmem_cap = getattr(pltpu.get_tpu_info(), "vmem_capacity_bytes", None)
    except Exception:
        vmem_cap = None
    if not vmem_cap or vmem_cap < (16 << 20):
        vmem_cap = 64 << 20                       # conservative (v7x physical)
    vmem_limit = int(vmem_cap * 3) // 4           # leave headroom for scratch
    block_rows = 1024 if vmem_cap >= (96 << 20) else 512
    return block_rows, vmem_limit


# --------------------------------------------------------------------------
# Forward
# --------------------------------------------------------------------------
def protonet_forward(x, params, *, block_rows=None, vmem_limit_bytes=None,
                     out_dtype=jnp.float32):
    """softmax(x @ weight.T + bias, axis=1) with params from prepare_protonet_params.

    x: [B, F] (float32 or bfloat16). out_dtype=jnp.bfloat16 halves output HBM
    writeback (useful on v5e) if downstream tolerates it.
    """
    w_p, b_p, C, F = params
    B, Fx = x.shape
    assert Fx == F, f"x feature dim {Fx} != prepared feature dim {F}"
    C_pad, F_pad = w_p.shape

    if block_rows is None or vmem_limit_bytes is None:
        br, vl = _default_config()
        block_rows = block_rows or br
        vmem_limit_bytes = vmem_limit_bytes or vl

    x_b = jnp.dtype(x.dtype).itemsize
    w_b = jnp.dtype(w_p.dtype).itemsize
    o_b = jnp.dtype(out_dtype).itemsize

    # Honest VMEM estimate for a batch tile of t rows.
    def _vmem_bytes(t):
        io = 2 * t * F_pad * x_b + 2 * t * C_pad * o_b        # double-buffered x / out
        # Conservative: assume the resident weight/bias are still double
        # buffered (the pl.Buffered(1) request below only adds headroom).
        wgt = 2 * (C_pad * F_pad * w_b + C_pad * 4)
        # In-kernel f32 intermediates (logits + exp), bf16 cast of the x tile,
        # and the small (t, 1) reductions.
        interm = 2 * t * C_pad * 4 + t * F_pad * w_b + 2 * t * 4
        return io + wgt + interm

    # ---- batch tiling -----------------------------------------------------
    tm = min(block_rows, _round_up(B, 8))
    # Megacore (v7x: 2 TensorCores): for medium/large batches make sure the
    # "parallel" axis has at least two grid steps so both cores get work,
    # while keeping each tile >= 256 rows (near the HBM-roofline knee).
    if B > 512:
        tm = min(tm, max(256, _round_up(-(-B // 2), 8)))
    # Shrink until the estimate fits the budget.
    while tm > 8 and _vmem_bytes(tm) > vmem_limit_bytes:
        tm = max(8, _round_up(tm // 2, 8))
    tm = max(8, tm)
    # TODO(synk): if the resident weight alone (C_pad*F_pad*w_b) ever exceeds
    # the VMEM budget, add a class-axis grid dimension (stream W tiles) with a
    # two-pass / online softmax instead of only shrinking tm.

    B_pad = _round_up(B, tm)
    pad_rows, pad_cols = B_pad - B, F_pad - F
    x_p = jnp.pad(x, ((0, pad_rows), (0, pad_cols))) if (pad_rows or pad_cols) else x

    def _build(resident_pipeline_mode):
        return pl.pallas_call(
            protonet_kernel,
            out_shape=jax.ShapeDtypeStruct((B_pad, C_pad), out_dtype),
            grid_spec=pl.GridSpec(
                grid=(B_pad // tm,),
                in_specs=[
                    pl.BlockSpec((tm, F_pad), lambda i: (i, 0)),      # x batch tile
                    pl.BlockSpec((C_pad, F_pad), lambda i: (0, 0),    # W resident
                                 pipeline_mode=resident_pipeline_mode),
                    pl.BlockSpec((1, C_pad), lambda i: (0, 0),        # bias resident
                                 pipeline_mode=resident_pipeline_mode),
                ],
                out_specs=pl.BlockSpec((tm, C_pad), lambda i: (i, 0)),
            ),
            compiler_params=pltpu.CompilerParams(
                dimension_semantics=("parallel",),    # batch tiles independent
                vmem_limit_bytes=int(vmem_limit_bytes),
            ),
        )

    try:
        # Constant index_map => resident weight/bias need no double buffering;
        # Buffered(1) halves their VMEM footprint (extra headroom for tm).
        out = _build(pl.Buffered(1))(x_p, w_p, b_p)
    except Exception:
        # Fallback if this jax version rejects pipeline_mode on this path.
        out = _build(None)(x_p, w_p, b_p)

    # Strip batch and class padding (padded classes have exactly-zero prob,
    # so the kept rows still sum to 1).
    return out[:B, :C]


def reference_forward(x, weight, bias):
    return jax.nn.softmax(x @ weight.T + bias, axis=1)


if __name__ == "__main__":
    # Small shapes consistent with the module: batch=8, feature_dim=32, classes=16.
    B, FEAT, NUM_CLASSES = 8, 32, 16

    key = jax.random.PRNGKey(0)
    kx, kw, kb = jax.random.split(key, 3)

    x = jax.random.normal(kx, (B, FEAT), dtype=jnp.float32)
    # PyTorch Linear parameter shapes: W [C, F], b [C].
    weight = jax.random.normal(kw, (NUM_CLASSES, FEAT), dtype=jnp.float32) * 0.1
    bias = jax.random.normal(kb, (NUM_CLASSES,), dtype=jnp.float32) * 0.1

    params = prepare_protonet_params(weight, bias)          # once, at init time
    out = jax.block_until_ready(protonet_forward(x, params))
    ref = reference_forward(x, weight, bias)

    assert out.shape == (B, NUM_CLASSES)
    # bf16 matmul (f32 accumulation) gives ~1e-3 logit error; probabilities
    # match the f32 reference well within 2e-3.
    assert jnp.allclose(out, ref, atol=2e-3, rtol=2e-3), "mismatch vs reference"
    # Exact softmax normalization (no approx reciprocal): rows sum to 1.
    assert jnp.allclose(jnp.sum(out, axis=1), 1.0, atol=1e-4), "rows must sum to 1"

    print("KERNEL_OK")
</pallas_src>

<mosaic_0001>
module attributes {stable_mosaic.version = 11 : i64} {
  func.func @protonet_kernel(%arg0: i32, %arg1: memref<8x128xf32, #tpu.memory_space<vmem>>, %arg2: memref<128x128xbf16, #tpu.memory_space<vmem>>, %arg3: memref<1x128xf32, #tpu.memory_space<vmem>>, %arg4: memref<8x128xf32, #tpu.memory_space<vmem>>) attributes {dimension_semantics = [#tpu.dimension_semantics<parallel>], iteration_bounds = array<i64: 1>, scalar_prefetch = 0 : i64, scratch_operands = 0 : i64, tpu.core_type = #tpu.core_type<tc>, window_params = [{transform_indices = @transform_0, window_bounds = array<i64: 8, 128>}, {pipeline_mode = #tpu.pipeline_mode<synchronous>, transform_indices = @transform_1, window_bounds = array<i64: 128, 128>}, {pipeline_mode = #tpu.pipeline_mode<synchronous>, transform_indices = @transform_2, window_bounds = array<i64: 1, 128>}, {transform_indices = @transform_3, window_bounds = array<i64: 8, 128>}]} {
    %c0 = arith.constant 0 : index
    %c0_0 = arith.constant 0 : index
    %0 = vector.load %arg1[%c0, %c0_0] : memref<8x128xf32, #tpu.memory_space<vmem>>, vector<8x128xf32>
    %1 = arith.truncf %0 : vector<8x128xf32> to vector<8x128xbf16>
    %c0_1 = arith.constant 0 : index
    %c0_2 = arith.constant 0 : index
    %2 = vector.load %arg2[%c0_1, %c0_2] : memref<128x128xbf16, #tpu.memory_space<vmem>>, vector<128x128xbf16>
    %cst = arith.constant dense<0.000000e+00> : vector<8x128xf32>
    %3 = tpu.matmul %1, %2, %cst {dimension_numbers = #tpu.dot_dimension_numbers<[1], [1], [0], [0], [0, 0, 1, 0], [], []>} : vector<8x128xbf16>, vector<128x128xbf16>, vector<8x128xf32> -> vector<8x128xf32>
    %c0_3 = arith.constant 0 : index
    %c0_4 = arith.constant 0 : index
    %4 = vector.load %arg3[%c0_3, %c0_4] : memref<1x128xf32, #tpu.memory_space<vmem>>, vector<1x128xf32>
    %5 = vector.broadcast %4 : vector<1x128xf32> to vector<8x128xf32>
    %6 = arith.addf %3, %5 : vector<8x128xf32>
    %cst_5 = arith.constant dense<0xFF800000> : vector<8xf32>
    %7 = vector.multi_reduction <maximumf>, %6, %cst_5 [1] : vector<8x128xf32> to vector<8xf32>
    %8 = vector.shape_cast %7 : vector<8xf32> to vector<8x1xf32>
    %9 = vector.broadcast %8 : vector<8x1xf32> to vector<8x128xf32>
    %10 = arith.subf %6, %9 : vector<8x128xf32>
    %11 = math.exp %10 : vector<8x128xf32>
    %cst_6 = arith.constant dense<0.000000e+00> : vector<8xf32>
    %12 = vector.multi_reduction <add>, %11, %cst_6 [1] : vector<8x128xf32> to vector<8xf32>
    %13 = vector.shape_cast %12 : vector<8xf32> to vector<8x1xf32>
    %14 = tpu.reciprocal %13 : vector<8x1xf32> -> vector<8x1xf32>
    %15 = vector.broadcast %14 : vector<8x1xf32> to vector<8x128xf32>
    %16 = arith.mulf %11, %15 : vector<8x128xf32>
    %c0_7 = arith.constant 0 : index
    %c0_8 = arith.constant 0 : index
    %17 = vector.load %arg4[%c0_7, %c0_8] : memref<8x128xf32, #tpu.memory_space<vmem>>, vector<8x128xf32>
    tpu.vector_store %arg4[%c0_7, %c0_8], %16 {strides = array<i32>} : memref<8x128xf32, #tpu.memory_space<vmem>>, vector<8x128xf32>,
    return
  }
  func.func @transform_0(%arg0: i32) -> (i32, i32) {
    %c0_i32 = arith.constant 0 : i32
    %c0_i32_0 = arith.constant 0 : i32
    return %arg0, %c0_i32 : i32, i32
  }
  func.func @transform_1(%arg0: i32) -> (i32, i32) {
    %c0_i32 = arith.constant 0 : i32
    %c0_i32_0 = arith.constant 0 : i32
    %c0_i32_1 = arith.constant 0 : i32
    return %c0_i32, %c0_i32_0 : i32, i32
  }
  func.func @transform_2(%arg0: i32) -> (i32, i32) {
    %c0_i32 = arith.constant 0 : i32
    %c0_i32_0 = arith.constant 0 : i32
    %c0_i32_1 = arith.constant 0 : i32
    return %c0_i32, %c0_i32_0 : i32, i32
  }
  func.func @transform_3(%arg0: i32) -> (i32, i32) {
    %c0_i32 = arith.constant 0 : i32
    %c0_i32_0 = arith.constant 0 : i32
    return %arg0, %c0_i32 : i32, i32
  }
}

module attributes {stable_mosaic.version = 11 : i64} {
  func.func @protonet_kernel(%arg0: i32, %arg1: memref<8x128xf32, #tpu.memory_space<vmem>>, %arg2: memref<128x128xbf16, #tpu.memory_space<vmem>>, %arg3: memref<1x128xf32, #tpu.memory_space<vmem>>, %arg4: memref<8x128xf32, #tpu.memory_space<vmem>>) attributes {dimension_semantics = [#tpu.dimension_semantics<parallel>], iteration_bounds = array<i64: 1>, scalar_prefetch = 0 : i64, scratch_operands = 0 : i64, tpu.core_type = #tpu.core_type<tc>, window_params = [{transform_indices = @transform_0, window_bounds = array<i64: 8, 128>}, {pipeline_mode = #tpu.pipeline_mode<synchronous>, transform_indices = @transform_1, window_bounds = array<i64: 128, 128>}, {pipeline_mode = #tpu.pipeline_mode<synchronous>, transform_indices = @transform_2, window_bounds = array<i64: 1, 128>}, {transform_indices = @transform_3, window_bounds = array<i64: 8, 128>}]} {
    %c0 = arith.constant 0 : index
    %c0_0 = arith.constant 0 : index
    %0 = vector.load %arg1[%c0, %c0_0] : memref<8x128xf32, #tpu.memory_space<vmem>>, vector<8x128xf32>
    %1 = arith.truncf %0 : vector<8x128xf32> to vector<8x128xbf16>
    %c0_1 = arith.constant 0 : index
    %c0_2 = arith.constant 0 : index
    %2 = vector.load %arg2[%c0_1, %c0_2] : memref<128x128xbf16, #tpu.memory_space<vmem>>, vector<128x128xbf16>
    %cst = arith.constant dense<0.000000e+00> : vector<8x128xf32>
    %3 = tpu.matmul %1, %2, %cst {dimension_numbers = #tpu.dot_dimension_numbers<[1], [1], [0], [0], [0, 0, 1, 0], [], []>} : vector<8x128xbf16>, vector<128x128xbf16>, vector<8x128xf32> -> vector<8x128xf32>
    %c0_3 = arith.constant 0 : index
    %c0_4 = arith.constant 0 : index
    %4 = vector.load %arg3[%c0_3, %c0_4] : memref<1x128xf32, #tpu.memory_space<vmem>>, vector<1x128xf32>
    %5 = vector.broadcast %4 : vector<1x128xf32> to vector<8x128xf32>
    %6 = arith.addf %3, %5 : vector<8x128xf32>
    %cst_5 = arith.constant dense<0xFF800000> : vector<8xf32>
    %7 = vector.multi_reduction <maximumf>, %6, %cst_5 [1] : vector<8x128xf32> to vector<8xf32>
    %8 = vector.shape_cast %7 : vector<8xf32> to vector<8x1xf32>
    %9 = vector.broadcast %8 : vector<8x1xf32> to vector<8x128xf32>
    %10 = arith.subf %6, %9 : vector<8x128xf32>
    %11 = math.exp %10 : vector<8x128xf32>
    %cst_6 = arith.constant dense<0.000000e+00> : vector<8xf32>
    %12 = vector.multi_reduction <add>, %11, %cst_6 [1] : vector<8x128xf32> to vector<8xf32>
    %13 = vector.shape_cast %12 : vector<8xf32> to vector<8x1xf32>
    %14 = tpu.reciprocal %13 : vector<8x1xf32> -> vector<8x1xf32>
    %15 = vector.broadcast %14 : vector<8x1xf32> to vector<8x128xf32>
    %16 = arith.mulf %11, %15 : vector<8x128xf32>
    %c0_7 = arith.constant 0 : index
    %c0_8 = arith.constant 0 : index
    %17 = vector.load %arg4[%c0_7, %c0_8] : memref<8x128xf32, #tpu.memory_space<vmem>>, vector<8x128xf32>
    tpu.vector_store %arg4[%c0_7, %c0_8], %16 {strides = array<i32>} : memref<8x128xf32, #tpu.memory_space<vmem>>, vector<8x128xf32>,
    return
  }
  func.func @transform_0(%arg0: i32) -> (i32, i32) {
    %c0_i32 = arith.constant 0 : i32
    %c0_i32_0 = arith.constant 0 : i32
    return %arg0, %c0_i32 : i32, i32
  }
  func.func @transform_1(%arg0: i32) -> (i32, i32) {
    %c0_i32 = arith.constant 0 : i32
    %c0_i32_0 = arith.constant 0 : i32
    %c0_i32_1 = arith.constant 0 : i32
    return %c0_i32, %c0_i32_0 : i32, i32
  }
  func.func @transform_2(%arg0: i32) -> (i32, i32) {
    %c0_i32 = arith.constant 0 : i32
    %c0_i32_0 = arith.constant 0 : i32
    %c0_i32_1 = arith.constant 0 : i32
    return %c0_i32, %c0_i32_0 : i32, i32
  }
  func.func @transform_3(%arg0: i32) -> (i32, i32) {
    %c0_i32 = arith.constant 0 : i32
    %c0_i32_0 = arith.constant 0 : i32
    return %arg0, %c0_i32 : i32, i32
  }
}

</mosaic_0001>

<bundles_post_ra>
// kernel: tpu_custom_call.1
= control target key start
LH: loop header
LB: loop body
LE: loop exit
PB: predicated region body
PF: predicated region fallthrough
CT: control target
= control target key end

     0   :  { %8 = vsyncpa [#allocation3], 0  ;;  %s334_s0 = inlined_call_operand.hbm [shape: f32[8,128], index: 0, kind: input, shape index: {}]   ;;  %s335_s1 = inlined_call_operand.hbm [shape: bf16[128,128], index: 1, kind: input, shape index: {}]   ;;  %s336_s2 = inlined_call_operand.vmem [shape: f32[1,128], index: 2, kind: input, shape index: {}]   ;;  %s337_s3 = inlined_call_operand.hbm [shape: f32[8,128], index: 3, kind: output, shape index: {}]  }
   0x1   :  { %9 = vsyncpa [#allocation6], 0 }
   0x2   :  { %10 = vsyncpa [#allocation4], 0  ;;  %s16_s14 = sshll.u32 %s334_s0, 4  ;;  %s297_s15 = smov [#allocation2]   ;;  %s17_s14 = int_to_ptr.hbm [resolvable:$true] %s16_s14 }
   0x3   :  { %s18_s16 = sshll.u32 %s297_s15, 4  ;;  %s26_s19 = sshll.u32 %s335_s1, 4  ;;  %s19_s16 = int_to_ptr.vmem [resolvable:$true] %s18_s16  ;;  %s27_s19 = int_to_ptr.hbm [resolvable:$true] %s26_s19 }
   0x4   :  { %21 = dma.hbm_to_vmem [thread:$0]  %s17_s14, 128, %s19_s16, [#allocation3]  }
   0x5   :  { %s298_s20 = smov [#allocation5]   ;;  %s299_s22 = smov 64  }
   0x6   :  { %s28_s21 = sshll.u32 %s298_s20, 4  ;;  %s300_s23 = smov 4   ;;  %s29_s21 = int_to_ptr.vmem [resolvable:$true] %s28_s21 }
   0x7   :  { %34 = dma.hbm_to_vmem [thread:$0]  %s27_s19, 1024, %s29_s21, [#allocation6], %s299_s22, %s299_s22, %s300_s23  }
   0x8   :  { %291 = dma.done.wait [#allocation3], 128  }
   0x9   :  { %292 = vsyncadd [#allocation3], 4294967168 }
   0xa   :  { %293 = dma.done.wait [#allocation6], 1024  }
   0xb   :  { %294 = vsyncadd [#allocation6], 4294966272  ;;  %v208_v0 = vld [vmem:[#allocation5 + $0x38] sm:$0xff]  ;;  %v207_v1 = vld [vmem:[#allocation5 + $0x30] sm:$0xff]  ;;  %s158_s27 = sshll.u32 %s337_s3, 4  ;;  %s159_s27 = int_to_ptr.hbm [resolvable:$true] %s158_s27 }
   0xc   :  { %115 = vmatpush.bf16.xpose.msra.mxu0 %v208_v0  ;;  %v206_v2 = vld [vmem:[#allocation5 + $0x28] sm:$0xff]  ;;  %v205_v3 = vld [vmem:[#allocation5 + $0x20] sm:$0xff]  ;;  %v204_v4 = vld [vmem:[#allocation5 + $0x18] sm:$0xff] }
   0xd   :  { %v203_v5 = vld [vmem:[#allocation5 + $0x10] sm:$0xff]  ;;  %v202_v6 = vld [vmem:[#allocation5 + $0x8] sm:$0xff]  ;;  %v201_v7 = vld [vmem:[#allocation5] sm:$0xff] }
   0xe   :  { %v45_v8 = vld [vmem:[#allocation2] sm:$0xff] }
   0xf   :  { %v46_v9 = vpack.c.bf16 %v45_v8, %v45_v8  ;;  %v214_v10 = vld [vmem:[%s336_s2] ss:$0 sm:$0xff]  ;;  %s301_s2 = smov [#allocation7]  }
  0x10   :  { %s156_s24 = sshll.u32 %s301_s2, 4  ;;  %s157_s24 = int_to_ptr.vmem [resolvable:$true] %s156_s24 }
  0x14   :  { %116 = vmatpush.bf16.xpose.msra.mxu0 %v207_v1 }
  0x1c   :  { %117 = vmatpush.bf16.xpose.msra.mxu0 %v206_v2 }
  0x24   :  { %118 = vmatpush.bf16.xpose.msra.mxu0 %v205_v3 }
  0x2c   :  { %119 = vmatpush.bf16.xpose.msra.mxu0 %v204_v4 }
  0x34   :  { %120 = vmatpush.bf16.xpose.msra.mxu0 %v203_v5 }
  0x3c   :  { %121 = vmatpush.bf16.xpose.msra.mxu0 %v202_v6 }
  0x44   :  { %122 = vmatpush.bf16.xpose.msra.mxu0 %v201_v7 }
  0x4b   :  { %123 = vmatmul.bf16.vlgmr.msra.gmra.mxu0 %v46_v9 }
  0xc8   :  { %v124_v11 = vpop.f32.mrf.mxu0 }
  0xc9   :  { %v125_v12 = vadd.f32 %v214_v10, %v124_v11 }
  0xcb   :  { %128 = vmax.xlane.f32.xlu0 %v125_v12 }
  0xd0   :  { %v126_v13 = vpop.f32.mrf.mxu0 }
 0x13e   :  { %v129_v14 = vpop.xlane.xlu0 %128 }
 0x13f   :  { %v130_v15 = vsub.f32 %v125_v12, %v129_v14 }
 0x141   :  { %v131_v16 = vmul.f32 1.442695, %v130_v15 }
 0x143   :  { %215 = vpow2.f32 %v131_v16 }
 0x149   :  { %v216_v17 = vpop.eup %215 }
 0x14a   :  { %133 = vadd.xlane.f32.xlu0 %v216_v17 }
 0x1bd   :  { %v134_v18 = vpop.xlane.xlu0 %133 }
 0x1be   :  { %217 = vrcp.f32 %v134_v18  ;;  %v146_v22 = vand.u32 2147483648, %v134_v18  ;;  %v144_v24 = vand.u32 2147483647, %v134_v18  ;;  %vm140_vm1 = vweird.f32 %v134_v18 }
 0x1c0   :  { %v147_v26 = vor.u32 1.1754944e-38, %v146_v22  ;;  %vm145_vm3 = vcmp.eq.f32.partialorder %v144_v24, 8.507059e+37 }
 0x1c4   :  { %v218_v19 = vpop.eup %217 }
 0x1c5   :  { %v136_v20 = vmul.f32 %v218_v19, %v134_v18  ;;  %vm141_vm0 = vweird.f32 %v218_v19 }
 0x1c6   :  { %vm142_vm2 = vmor %vm140_vm1, %vm141_vm0 }
 0x1c7   :  { %v137_v21 = vsub.f32 1.0, %v136_v20 }
 0x1c9   :  { %v138_v23 = vmul.f32 %v218_v19, %v137_v21 }
 0x1cb   :  { %v139_v25 = vadd.f32 %v218_v19, %v138_v23 }
 0x1cd   :  { %v143_v27 = vsel %vm142_vm2, %v218_v19, %v139_v25 }
 0x1ce   :  { %v148_v28 = vsel %vm145_vm3, %v147_v26, %v143_v27 }
 0x1cf   :  { %v149_v29 = vmul.f32 %v216_v17, %v148_v28 }
 0x1d1   :  { %150 = vst [vmem:[#allocation7] sm:$0xff] %v149_v29 }
 0x1d2   :  { %161 = dma.vmem_to_hbm [thread:$0]  %s157_s24, 128, %s159_s27, [#allocation4]  }
 0x1d3   :  { %295 = dma.done.wait [#allocation4], 128  }
 0x1d4   :  { %296 = vsyncadd [#allocation4], 4294967168 }
 0x1d5   :  { %166 = vsyncpa [#allocation3], 1 }
 0x1d6   :  { %167 = vsyncpa [#allocation6], 1 }
 0x1d7   :  { %168 = vsyncpa [#allocation4], 1 }

// kernel: tpu_custom_call.1
= control target key start
LH: loop header
LB: loop body
LE: loop exit
PB: predicated region body
PF: predicated region fallthrough
CT: control target
= control target key end

     0   :  { %8 = vsyncpa [#allocation3], 0  ;;  %s334_s0 = inlined_call_operand.hbm [shape: f32[8,128], index: 0, kind: input, shape index: {}]   ;;  %s335_s1 = inlined_call_operand.hbm [shape: bf16[128,128], index: 1, kind: input, shape index: {}]   ;;  %s336_s2 = inlined_call_operand.vmem [shape: f32[1,128], index: 2, kind: input, shape index: {}]   ;;  %s337_s3 = inlined_call_operand.hbm [shape: f32[8,128], index: 3, kind: output, shape index: {}]  }
   0x1   :  { %9 = vsyncpa [#allocation6], 0 }
   0x2   :  { %10 = vsyncpa [#allocation4], 0  ;;  %s16_s14 = sshll.u32 %s334_s0, 4  ;;  %s297_s15 = smov [#allocation2]   ;;  %s17_s14 = int_to_ptr.hbm [resolvable:$true] %s16_s14 }
   0x3   :  { %s18_s16 = sshll.u32 %s297_s15, 4  ;;  %s26_s19 = sshll.u32 %s335_s1, 4  ;;  %s19_s16 = int_to_ptr.vmem [resolvable:$true] %s18_s16  ;;  %s27_s19 = int_to_ptr.hbm [resolvable:$true] %s26_s19 }
   0x4   :  { %21 = dma.hbm_to_vmem [thread:$0]  %s17_s14, 128, %s19_s16, [#allocation3]  }
   0x5   :  { %s298_s20 = smov [#allocation5]   ;;  %s299_s22 = smov 64  }
   0x6   :  { %s28_s21 = sshll.u32 %s298_s20, 4  ;;  %s300_s23 = smov 4   ;;  %s29_s21 = int_to_ptr.vmem [resolvable:$true] %s28_s21 }
   0x7   :  { %34 = dma.hbm_to_vmem [thread:$0]  %s27_s19, 1024, %s29_s21, [#allocation6], %s299_s22, %s299_s22, %s300_s23  }
   0x8   :  { %291 = dma.done.wait [#allocation3], 128  }
   0x9   :  { %292 = vsyncadd [#allocation3], 4294967168 }
   0xa   :  { %293 = dma.done.wait [#allocation6], 1024  }
   0xb   :  { %294 = vsyncadd [#allocation6], 4294966272  ;;  %v208_v0 = vld [vmem:[#allocation5 + $0x38] sm:$0xff]  ;;  %v207_v1 = vld [vmem:[#allocation5 + $0x30] sm:$0xff]  ;;  %s158_s27 = sshll.u32 %s337_s3, 4  ;;  %s159_s27 = int_to_ptr.hbm [resolvable:$true] %s158_s27 }
   0xc   :  { %115 = vmatpush.bf16.xpose.msra.mxu0 %v208_v0  ;;  %v206_v2 = vld [vmem:[#allocation5 + $0x28] sm:$0xff]  ;;  %v205_v3 = vld [vmem:[#allocation5 + $0x20] sm:$0xff]  ;;  %v204_v4 = vld [vmem:[#allocation5 + $0x18] sm:$0xff] }
   0xd   :  { %v203_v5 = vld [vmem:[#allocation5 + $0x10] sm:$0xff]  ;;  %v202_v6 = vld [vmem:[#allocation5 + $0x8] sm:$0xff]  ;;  %v201_v7 = vld [vmem:[#allocation5] sm:$0xff] }
   0xe   :  { %v45_v8 = vld [vmem:[#allocation2] sm:$0xff] }
   0xf   :  { %v46_v9 = vpack.c.bf16 %v45_v8, %v45_v8  ;;  %v214_v10 = vld [vmem:[%s336_s2] ss:$0 sm:$0xff]  ;;  %s301_s2 = smov [#allocation7]  }
  0x10   :  { %s156_s24 = sshll.u32 %s301_s2, 4  ;;  %s157_s24 = int_to_ptr.vmem [resolvable:$true] %s156_s24 }
  0x14   :  { %116 = vmatpush.bf16.xpose.msra.mxu0 %v207_v1 }
  0x1c   :  { %117 = vmatpush.bf16.xpose.msra.mxu0 %v206_v2 }
  0x24   :  { %118 = vmatpush.bf16.xpose.msra.mxu0 %v205_v3 }
  0x2c   :  { %119 = vmatpush.bf16.xpose.msra.mxu0 %v204_v4 }
  0x34   :  { %120 = vmatpush.bf16.xpose.msra.mxu0 %v203_v5 }
  0x3c   :  { %121 = vmatpush.bf16.xpose.msra.mxu0 %v202_v6 }
  0x44   :  { %122 = vmatpush.bf16.xpose.msra.mxu0 %v201_v7 }
  0x4b   :  { %123 = vmatmul.bf16.vlgmr.msra.gmra.mxu0 %v46_v9 }
  0xc8   :  { %v124_v11 = vpop.f32.mrf.mxu0 }
  0xc9   :  { %v125_v12 = vadd.f32 %v214_v10, %v124_v11 }
  0xcb   :  { %128 = vmax.xlane.f32.xlu0 %v125_v12 }
  0xd0   :  { %v126_v13 = vpop.f32.mrf.mxu0 }
 0x13e   :  { %v129_v14 = vpop.xlane.xlu0 %128 }
 0x13f   :  { %v130_v15 = vsub.f32 %v125_v12, %v129_v14 }
 0x141   :  { %v131_v16 = vmul.f32 1.442695, %v130_v15 }
 0x143   :  { %215 = vpow2.f32 %v131_v16 }
 0x149   :  { %v216_v17 = vpop.eup %215 }
 0x14a   :  { %133 = vadd.xlane.f32.xlu0 %v216_v17 }
 0x1bd   :  { %v134_v18 = vpop.xlane.xlu0 %133 }
 0x1be   :  { %217 = vrcp.f32 %v134_v18  ;;  %v146_v22 = vand.u32 2147483648, %v134_v18  ;;  %v144_v24 = vand.u32 2147483647, %v134_v18  ;;  %vm140_vm1 = vweird.f32 %v134_v18 }
 0x1c0   :  { %v147_v26 = vor.u32 1.1754944e-38, %v146_v22  ;;  %vm145_vm3 = vcmp.eq.f32.partialorder %v144_v24, 8.507059e+37 }
 0x1c4   :  { %v218_v19 = vpop.eup %217 }
 0x1c5   :  { %v136_v20 = vmul.f32 %v218_v19, %v134_v18  ;;  %vm141_vm0 = vweird.f32 %v218_v19 }
 0x1c6   :  { %vm142_vm2 = vmor %vm140_vm1, %vm141_vm0 }
 0x1c7   :  { %v137_v21 = vsub.f32 1.0, %v136_v20 }
 0x1c9   :  { %v138_v23 = vmul.f32 %v218_v19, %v137_v21 }
 0x1cb   :  { %v139_v25 = vadd.f32 %v218_v19, %v138_v23 }
 0x1cd   :  { %v143_v27 = vsel %vm142_vm2, %v218_v19, %v139_v25 }
 0x1ce   :  { %v148_v28 = vsel %vm145_vm3, %v147_v26, %v143_v27 }
 0x1cf   :  { %v149_v29 = vmul.f32 %v216_v17, %v148_v28 }
 0x1d1   :  { %150 = vst [vmem:[#allocation7] sm:$0xff] %v149_v29 }
 0x1d2   :  { %161 = dma.vmem_to_hbm [thread:$0]  %s157_s24, 128, %s159_s27, [#allocation4]  }
 0x1d3   :  { %295 = dma.done.wait [#allocation4], 128  }
 0x1d4   :  { %296 = vsyncadd [#allocation4], 4294967168 }
 0x1d5   :  { %166 = vsyncpa [#allocation3], 1 }
 0x1d6   :  { %167 = vsyncpa [#allocation6], 1 }
 0x1d7   :  { %168 = vsyncpa [#allocation4], 1 }

</bundles_post_ra>
